<compile_context>
chip_gen: v7x
topology: tpu7x:2x2x1
jax: 0.10.0
libtpu: 0.0.40
codegen_flags: <defaults>
</compile_context>

<pallas_src>
import functools
import math

import jax
import jax.numpy as jnp
from jax import lax
from jax.experimental import pallas as pl
from jax.experimental.pallas import tpu as pltpu


def _round_up(v, m):
    return ((v + m - 1) // m) * m


def _cdiv(a, b):
    return (a + b - 1) // b


def _vmem_capacity_bytes():
    """Physical VMEM capacity; conservative 64 MiB fallback (v7x per-TC)."""
    try:
        cap = int(pltpu.get_tpu_info().vmem_capacity_bytes)
        if cap > 0:
            return cap
    except Exception:
        pass
    return 64 << 20


def _footprint_bytes(tm, to, tk, in_itemsize, out_itemsize):
    # double-buffered x/w input tiles + double-buffered output tile
    # + f32 accumulator scratch + (negligible) bias tile.
    return (2 * (tm * tk + to * tk) * in_itemsize
            + 2 * tm * to * out_itemsize
            + tm * to * 4
            + 2 * to * 4)


def _select_tiles(n, out_f, in_f, in_itemsize, out_itemsize, vmem_cap):
    """Pick (tile_m, tile_o, tile_k) for this chip generation."""
    m_max = _round_up(max(n, 1), 128)
    o_max = _round_up(max(out_f, 1), 128)
    k_max = _round_up(max(in_f, 1), 128)

    budget = int(0.78 * vmem_cap)
    # Small-VMEM chips (v7x: 64 MiB/TC): cap output tiles at 1536 so the f32
    # accumulator + double-buffered inputs stay well clear of the limit.
    mo_cap = 2048 if vmem_cap >= (96 << 20) else 1536
    tk_floor = min(512, k_max)

    fallback = None
    for t_mo in (2048, 1536, 1024, 768, 512, 384, 256, 128):
        if t_mo > mo_cap:
            continue
        tm = min(t_mo, m_max)
        to = min(t_mo, o_max)
        for t_k in (2048, 1024, 512, 256, 128):
            tk = min(t_k, k_max)
            fp = _footprint_bytes(tm, to, tk, in_itemsize, out_itemsize)
            if fp <= budget:
                if tk >= tk_floor:
                    # Megacore: if the whole problem fits in one output block,
                    # split the larger parallel dim so both v7x TCs get work.
                    if (_cdiv(m_max, tm) * _cdiv(o_max, to) == 1
                            and max(m_max, o_max) >= 512):
                        if o_max >= m_max:
                            to = max(128, _round_up(o_max // 2, 128))
                        else:
                            tm = max(128, _round_up(m_max // 2, 128))
                    return tm, to, tk
                if fallback is None:
                    fallback = (tm, to, tk)
                break  # shrinking t_k further cannot reach tk_floor
    if fallback is not None:
        return fallback
    return min(128, m_max), min(128, o_max), min(128, k_max)


def _dense_kernel_ktiled(x_ref, w_ref, b_ref, o_ref, acc_ref, *, activation):
    """One (i, j, k) step with a resident f32 accumulator across the K axis."""
    k = pl.program_id(2)

    @pl.when(k == 0)
    def _():
        acc_ref[...] = jnp.zeros_like(acc_ref)

    # x @ W^T without materializing a transposed weight: contract last dims.
    acc_ref[...] += lax.dot_general(
        x_ref[...],
        w_ref[...],
        dimension_numbers=(((1,), (1,)), ((), ())),
        preferred_element_type=jnp.float32,
    )

    @pl.when(k == pl.num_programs(2) - 1)
    def _():
        y = acc_ref[...] + b_ref[...]          # bias added in f32
        if activation is not None:
            y = activation(y)
        o_ref[...] = y.astype(o_ref.dtype)


def _dense_kernel_single_k(x_ref, w_ref, b_ref, o_ref, *, activation):
    """One (i, j) step when the whole K dimension fits one tile (no scratch)."""
    y = lax.dot_general(
        x_ref[...],
        w_ref[...],
        dimension_numbers=(((1,), (1,)), ((), ())),
        preferred_element_type=jnp.float32,
    )
    y = y + b_ref[...]
    if activation is not None:
        y = activation(y)
    o_ref[...] = y.astype(o_ref.dtype)


def dense_forward(x, weight, bias=None, activation=None, *,
                  compute_dtype=None, tile_m=None, tile_o=None, tile_k=None):
    """Dense layer forward: y = activation(x @ W^T + b).

    Args:
      x:      (..., in_features)
      weight: (out_features, in_features)   (PyTorch nn.Linear convention)
      bias:   (out_features,) or None
      activation: optional *elementwise* callable fused into the kernel
      compute_dtype: optional matmul operand dtype (recommend jnp.bfloat16 for
        large GEMMs; accumulation is always f32). For best performance pre-cast
        the weight once at parameter setup instead of per call.
      tile_m/tile_o/tile_k: optional manual tile overrides (128-aligned).
    Returns:
      (..., out_features), same dtype as x.
    """
    orig_shape = x.shape
    in_f = orig_shape[-1]
    out_f, in_f_w = weight.shape
    assert in_f == in_f_w, "weight in_features mismatch"

    out_dtype = x.dtype
    x2 = x.reshape(-1, in_f)
    n = x2.shape[0]

    if compute_dtype is not None:
        if x2.dtype != compute_dtype:
            x2 = x2.astype(compute_dtype)
        if weight.dtype != compute_dtype:
            weight = weight.astype(compute_dtype)

    in_itemsize = jnp.dtype(x2.dtype).itemsize
    out_itemsize = jnp.dtype(out_dtype).itemsize
    vmem_cap = _vmem_capacity_bytes()

    tm_a, to_a, tk_a = _select_tiles(n, out_f, in_f, in_itemsize,
                                     out_itemsize, vmem_cap)
    tm = min(tile_m, _round_up(n, 128)) if tile_m else tm_a
    to = min(tile_o, _round_up(out_f, 128)) if tile_o else to_a
    tk = min(tile_k, _round_up(in_f, 128)) if tile_k else tk_a

    m_pad = _round_up(n, tm)
    o_pad = _round_up(out_f, to)
    k_pad = _round_up(in_f, tk)

    # Zero-padding (skipped when already aligned); zeros contribute nothing to
    # the contraction and padded rows/cols are sliced off below.
    if (m_pad, k_pad) != tuple(x2.shape):
        x2 = jnp.pad(x2, ((0, m_pad - n), (0, k_pad - in_f)))
    if (o_pad, k_pad) != tuple(weight.shape):
        weight = jnp.pad(weight, ((0, o_pad - out_f), (0, k_pad - in_f)))
    if bias is None:
        b2d = jnp.zeros((1, o_pad), dtype=jnp.float32)
    else:
        b2d = bias.astype(jnp.float32).reshape(1, out_f)
        if o_pad != out_f:
            b2d = jnp.pad(b2d, ((0, 0), (0, o_pad - out_f)))

    fp = _footprint_bytes(tm, to, tk, in_itemsize, out_itemsize)
    vmem_limit = int(min(max(int(1.25 * fp) + (4 << 20), 32 << 20),
                         int(0.88 * vmem_cap)))

    k_steps = k_pad // tk
    if k_steps == 1:
        # No K tiling: no accumulator scratch, no pl.when phases.
        kernel = functools.partial(_dense_kernel_single_k, activation=activation)
        grid_spec = pltpu.PrefetchScalarGridSpec(
            num_scalar_prefetch=0,
            grid=(m_pad // tm, o_pad // to),
            in_specs=[
                pl.BlockSpec((tm, tk), lambda i, j: (i, 0)),   # x rows
                pl.BlockSpec((to, tk), lambda i, j: (j, 0)),   # weight (out, in)
                pl.BlockSpec((1, to), lambda i, j: (0, j)),    # bias (f32)
            ],
            out_specs=pl.BlockSpec((tm, to), lambda i, j: (i, j)),
            scratch_shapes=[],
        )
        dim_sem = ("parallel", "parallel")
    else:
        kernel = functools.partial(_dense_kernel_ktiled, activation=activation)
        grid_spec = pltpu.PrefetchScalarGridSpec(
            num_scalar_prefetch=0,
            grid=(m_pad // tm, o_pad // to, k_steps),
            in_specs=[
                pl.BlockSpec((tm, tk), lambda i, j, k: (i, k)),   # x rows
                pl.BlockSpec((to, tk), lambda i, j, k: (j, k)),   # weight (out, in)
                pl.BlockSpec((1, to), lambda i, j, k: (0, j)),    # bias (f32)
            ],
            out_specs=pl.BlockSpec((tm, to), lambda i, j, k: (i, j)),
            scratch_shapes=[pltpu.VMEM((tm, to), jnp.float32)],
        )
        dim_sem = ("parallel", "parallel", "arbitrary")

    out = pl.pallas_call(
        kernel,
        out_shape=jax.ShapeDtypeStruct((m_pad, o_pad), out_dtype),
        grid_spec=grid_spec,
        compiler_params=pltpu.CompilerParams(
            dimension_semantics=dim_sem,
            vmem_limit_bytes=vmem_limit,
        ),
    )(x2, weight, b2d)

    if (m_pad, o_pad) != (n, out_f):
        out = out[:n, :out_f]
    return out.reshape(*orig_shape[:-1], out_f)


def xavier_uniform(key, shape, dtype=jnp.float32):
    # matches torch.nn.init.xavier_uniform_ (gain=1): U(-a, a), a = sqrt(6/(fan_in+fan_out))
    fan_out, fan_in = shape
    a = math.sqrt(6.0 / (fan_in + fan_out))
    return jax.random.uniform(key, shape, dtype=dtype, minval=-a, maxval=a)


if __name__ == "__main__":
    # TODO(synk): dropout with nonzero rate not implemented (default rate=0.0 / eval -> identity)
    key = jax.random.PRNGKey(0)
    k1, k2, k3, k4, k5, k6 = jax.random.split(key, 6)

    # Config 1: Dense(in_features=32, out_features=32, bias=True, activation=None)
    in_f, out_f = 32, 32
    x = jax.random.normal(k1, (2, 4, in_f), dtype=jnp.float32)
    w = xavier_uniform(k2, (out_f, in_f))          # nn.Linear weight layout
    b = 0.1 * jax.random.normal(k3, (out_f,), dtype=jnp.float32)

    y = dense_forward(x, w, b, activation=None)
    jax.block_until_ready(y)
    y_ref = x @ w.T + b
    assert y.shape == (2, 4, out_f)
    assert jnp.allclose(y, y_ref, atol=1e-5, rtol=1e-5)

    # Config 2: fused elementwise activation + non-128-aligned shapes (pad path)
    in_f2, out_f2 = 40, 24
    x_b = jax.random.normal(k4, (5, in_f2), dtype=jnp.float32)
    w_b = xavier_uniform(k5, (out_f2, in_f2))
    b_b = 0.05 * jax.random.normal(k6, (out_f2,), dtype=jnp.float32)
    y_b = dense_forward(x_b, w_b, b_b, activation=jax.nn.relu)
    jax.block_until_ready(y_b)
    y_b_ref = jax.nn.relu(x_b @ w_b.T + b_b)
    assert y_b.shape == (5, out_f2)
    assert jnp.allclose(y_b, y_b_ref, atol=1e-5, rtol=1e-5)

    # Config 3: bf16 operands with f32 accumulation (recommended fast path)
    y_bf = dense_forward(x, w, b, activation=None, compute_dtype=jnp.bfloat16)
    jax.block_until_ready(y_bf)
    assert jnp.allclose(y_bf, y_ref, atol=5e-2, rtol=5e-2)

    print("KERNEL_OK")
</pallas_src>

<mosaic_0001>
module attributes {stable_mosaic.version = 11 : i64} {
  func.func @_dense_kernel_single_k(%arg0: i32, %arg1: i32, %arg2: memref<128x128xf32, #tpu.memory_space<vmem>>, %arg3: memref<128x128xf32, #tpu.memory_space<vmem>>, %arg4: memref<1x128xf32, #tpu.memory_space<vmem>>, %arg5: memref<128x128xf32, #tpu.memory_space<vmem>>) attributes {dimension_semantics = [#tpu.dimension_semantics<parallel>, #tpu.dimension_semantics<parallel>], iteration_bounds = array<i64: 1, 1>, scalar_prefetch = 0 : i64, scratch_operands = 0 : i64, tpu.core_type = #tpu.core_type<tc>, window_params = [{transform_indices = @transform_0, window_bounds = array<i64: 128, 128>}, {transform_indices = @transform_1, window_bounds = array<i64: 128, 128>}, {transform_indices = @transform_2, window_bounds = array<i64: 1, 128>}, {transform_indices = @transform_3, window_bounds = array<i64: 128, 128>}]} {
    %c0 = arith.constant 0 : index
    %c0_0 = arith.constant 0 : index
    %0 = vector.load %arg2[%c0, %c0_0] : memref<128x128xf32, #tpu.memory_space<vmem>>, vector<128x128xf32>
    %c0_1 = arith.constant 0 : index
    %c0_2 = arith.constant 0 : index
    %1 = vector.load %arg3[%c0_1, %c0_2] : memref<128x128xf32, #tpu.memory_space<vmem>>, vector<128x128xf32>
    %cst = arith.constant dense<0.000000e+00> : vector<128x128xf32>
    %2 = tpu.matmul %0, %1, %cst {dimension_numbers = #tpu.dot_dimension_numbers<[1], [1], [0], [0], [0, 0, 1, 0], [], []>} : vector<128x128xf32>, vector<128x128xf32>, vector<128x128xf32> -> vector<128x128xf32>
    %c0_3 = arith.constant 0 : index
    %c0_4 = arith.constant 0 : index
    %3 = vector.load %arg4[%c0_3, %c0_4] : memref<1x128xf32, #tpu.memory_space<vmem>>, vector<1x128xf32>
    %4 = vector.broadcast %3 : vector<1x128xf32> to vector<128x128xf32>
    %5 = arith.addf %2, %4 : vector<128x128xf32>
    %c0_5 = arith.constant 0 : index
    %c0_6 = arith.constant 0 : index
    %6 = vector.load %arg5[%c0_5, %c0_6] : memref<128x128xf32, #tpu.memory_space<vmem>>, vector<128x128xf32>
    tpu.vector_store %arg5[%c0_5, %c0_6], %5 {strides = array<i32>} : memref<128x128xf32, #tpu.memory_space<vmem>>, vector<128x128xf32>,
    return
  }
  func.func @transform_0(%arg0: i32, %arg1: i32) -> (i32, i32) {
    %c0_i32 = arith.constant 0 : i32
    %c0_i32_0 = arith.constant 0 : i32
    return %arg0, %c0_i32 : i32, i32
  }
  func.func @transform_1(%arg0: i32, %arg1: i32) -> (i32, i32) {
    %c0_i32 = arith.constant 0 : i32
    %c0_i32_0 = arith.constant 0 : i32
    return %arg1, %c0_i32 : i32, i32
  }
  func.func @transform_2(%arg0: i32, %arg1: i32) -> (i32, i32) {
    %c0_i32 = arith.constant 0 : i32
    %c0_i32_0 = arith.constant 0 : i32
    return %c0_i32, %arg1 : i32, i32
  }
  func.func @transform_3(%arg0: i32, %arg1: i32) -> (i32, i32) {
    %c0_i32 = arith.constant 0 : i32
    return %arg0, %arg1 : i32, i32
  }
}

</mosaic_0001>

<bundles_post_ra>
// kernel: tpu_custom_call.1
= control target key start
LH: loop header
LB: loop body
LE: loop exit
PB: predicated region body
PF: predicated region fallthrough
CT: control target
= control target key end

     0   :  { %8 = vsyncpa [#allocation3], 0  ;;  %s548_s0 = inlined_call_operand.hbm [shape: f32[128,128], index: 0, kind: input, shape index: {}]   ;;  %s549_s1 = inlined_call_operand.hbm [shape: f32[128,128], index: 1, kind: input, shape index: {}]   ;;  %s550_s2 = inlined_call_operand.vmem [shape: f32[1,128], index: 2, kind: input, shape index: {}]   ;;  %s551_s3 = inlined_call_operand.hbm [shape: f32[128,128], index: 3, kind: output, shape index: {}]  }
   0x1   :  { %9 = vsyncpa [#allocation6], 0 }
   0x2   :  { %10 = vsyncpa [#allocation4], 0  ;;  %s475_s12 = smov [#allocation2]   ;;  %s403_s16 = scalar_lea.hbm %s548_s0, 2048 }
   0x3   :  { %s16_s13 = sshll.u32 %s475_s12, 4  ;;  %p404_p0 = scmp.ne.s32.totalorder %s548_s0, %s403_s16  ;;  %s17_s13 = int_to_ptr.vmem [resolvable:$true] %s16_s13 }
   0x4   :  { %p407_p1 = scmp.lt.u32.totalorder %s403_s16, %s548_s0 }
   0x6   :  { %p409_p2 = pnand %p407_p1, %p404_p0 }
   0x8   :  { %412 = shalt.err (!%p409_p2)
}
   0x9   :  { %s413_s21 = scalar_lea.vmem %s17_s13, 2048  ;;  %p418_p4 = scmp.lt.s32.totalorder %s17_s13, %s17_s13 }
   0xa   :  { %p414_p3 = scmp.ne.s32.totalorder %s17_s13, %s413_s21  ;;  %p419_p5 = scmp.lt.s32.totalorder %s413_s21, %s413_s21 }
   0xc   :  { %p420_p6 = por %p419_p5, %p418_p4 }
   0xe   :  { %p421_p7 = pnand %p420_p6, %p414_p3 }
  0x10   :  { %424 = shalt.err (!%p421_p7)
}
  0x11   :  { %s476_s22 = smov 128   ;;  %s477_s23 = smov 8  }
  0x12   :  { %22 = dma.hbm_to_vmem [thread:$0]  %s548_s0, 2048, %s17_s13, [#allocation3], %s476_s22, %s476_s22, %s477_s23  }
  0x13   :  { %s478_s26 = smov [#allocation5]   ;;  %s425_s30 = scalar_lea.hbm %s549_s1, 2048 }
  0x14   :  { %s28_s27 = sshll.u32 %s478_s26, 4  ;;  %p426_p8 = scmp.ne.s32.totalorder %s549_s1, %s425_s30  ;;  %s29_s27 = int_to_ptr.vmem [resolvable:$true] %s28_s27 }
  0x15   :  { %p429_p9 = scmp.lt.u32.totalorder %s425_s30, %s549_s1 }
  0x17   :  { %p431_p10 = pnand %p429_p9, %p426_p8 }
  0x19   :  { %434 = shalt.err (!%p431_p10)
}
  0x1a   :  { %s435_s8 = scalar_lea.vmem %s29_s27, 2048  ;;  %p440_p12 = scmp.lt.s32.totalorder %s29_s27, %s29_s27 }
  0x1b   :  { %p436_p11 = scmp.ne.s32.totalorder %s29_s27, %s435_s8  ;;  %p441_p13 = scmp.lt.s32.totalorder %s435_s8, %s435_s8 }
  0x1d   :  { %p442_p0 = por %p441_p13, %p440_p12 }
  0x1f   :  { %p443_p1 = pnand %p442_p0, %p436_p11 }
  0x21   :  { %446 = shalt.err (!%p443_p1)
}
  0x22   :  { %34 = dma.hbm_to_vmem [thread:$0]  %s549_s1, 2048, %s29_s27, [#allocation6], %s476_s22, %s476_s22, %s477_s23  }
  0x23   :  { %469 = dma.done.wait [#allocation3], 2048  }
  0x24   :  { %470 = vsyncadd [#allocation3], 4294965248 }
  0x25   :  { %471 = dma.done.wait [#allocation6], 2048  }
  0x26   :  { %472 = vsyncadd [#allocation6], 4294965248  ;;  %v59_v0 = vld [vmem:[#allocation5] sm:$0xff]  ;;  %v60_v1 = vld [vmem:[#allocation5 + $0x8] sm:$0xff] }
  0x27   :  { %v61_v2 = vld [vmem:[#allocation5 + $0x10] sm:$0xff]  ;;  %v350_v3 = vpack.c.bf16 %v60_v1, %v59_v0  ;;  %v62_v4 = vld [vmem:[#allocation5 + $0x18] sm:$0xff]  ;;  %v43_v6 = vld [vmem:[#allocation2] sm:$0xff] }
  0x28   :  { %v354_v5 = vpack.c.bf16 %v62_v4, %v61_v2  ;;  %v51_v7 = vld [vmem:[#allocation2 + $0x40] sm:$0xff]  ;;  %v64_v9 = vld [vmem:[#allocation5 + $0x28] sm:$0xff]  ;;  %326 = vmatprep.mubr.f32.mxu0 %v43_v6  ;;  %v65_v11 = vld [vmem:[#allocation5 + $0x30] sm:$0xff] }
  0x29   :  { %351 = vmatprep.subr.bf16.mxu0 %v350_v3  ;;  %382 = vmatprep.subr.bf16.mxu1 %v350_v3  ;;  %v63_v8 = vld [vmem:[#allocation5 + $0x20] sm:$0xff]  ;;  %v66_v12 = vld [vmem:[#allocation5 + $0x38] sm:$0xff]  ;;  %v68_v15 = vld [vmem:[#allocation5 + $0x48] sm:$0xff] }
  0x2a   :  { %353 = vmatpush3.bf16.xpose.msra.mxu0 %v350_v3  ;;  %390 = vmatpush3.bf16.xpose.msra.mxu1 %v350_v3  ;;  %v358_v10 = vpack.c.bf16 %v64_v9, %v63_v8  ;;  %v362_v13 = vpack.c.bf16 %v66_v12, %v65_v11  ;;  %v67_v14 = vld [vmem:[#allocation5 + $0x40] sm:$0xff]  ;;  %v69_v17 = vld [vmem:[#allocation5 + $0x50] sm:$0xff]  ;;  %v70_v18 = vld [vmem:[#allocation5 + $0x58] sm:$0xff] }
  0x2b   :  { %355 = vmatprep.subr.bf16.mxu0 %v354_v5  ;;  %383 = vmatprep.subr.bf16.mxu1 %v354_v5  ;;  %v366_v16 = vpack.c.bf16 %v68_v15, %v67_v14  ;;  %v370_v19 = vpack.c.bf16 %v70_v18, %v69_v17  ;;  %v71_v20 = vld [vmem:[#allocation5 + $0x60] sm:$0xff]  ;;  %v72_v21 = vld [vmem:[#allocation5 + $0x68] sm:$0xff]  ;;  %v73_v23 = vld [vmem:[#allocation5 + $0x70] sm:$0xff] }
  0x2c   :  { %338 = vmatprep.mubr.f32.mxu1 %v51_v7  ;;  %v374_v22 = vpack.c.bf16 %v72_v21, %v71_v20  ;;  %v74_v24 = vld [vmem:[#allocation5 + $0x78] sm:$0xff]  ;;  %v44_v26 = vld [vmem:[#allocation2 + $0x8] sm:$0xff]  ;;  %v45_v28 = vld [vmem:[#allocation2 + $0x10] sm:$0xff] }
  0x2d   :  { %v378_v25 = vpack.c.bf16 %v74_v24, %v73_v23  ;;  %v52_v27 = vld [vmem:[#allocation2 + $0x48] sm:$0xff]  ;;  %v53_v29 = vld [vmem:[#allocation2 + $0x50] sm:$0xff]  ;;  %v46_v30 = vld [vmem:[#allocation2 + $0x18] sm:$0xff] }
  0x2e   :  { %v54_v31 = vld [vmem:[#allocation2 + $0x58] sm:$0xff]  ;;  %v47_v32 = vld [vmem:[#allocation2 + $0x20] sm:$0xff]  ;;  %v48_v34 = vld [vmem:[#allocation2 + $0x28] sm:$0xff] }
  0x2f   :  { %v55_v33 = vld [vmem:[#allocation2 + $0x60] sm:$0xff]  ;;  %v56_v35 = vld [vmem:[#allocation2 + $0x68] sm:$0xff]  ;;  %v49_v36 = vld [vmem:[#allocation2 + $0x30] sm:$0xff] }
  0x30   :  { %v57_v37 = vld [vmem:[#allocation2 + $0x70] sm:$0xff]  ;;  %v50_v38 = vld [vmem:[#allocation2 + $0x38] sm:$0xff]  ;;  %v261_v40 = vld [vmem:[%s550_s2] ss:$0 sm:$0xff]  ;;  %s479_s2 = smov [#allocation7]  }
  0x31   :  { %v58_v39 = vld [vmem:[#allocation2 + $0x78] sm:$0xff]  ;;  %s248_s11 = sshll.u32 %s479_s2, 4  ;;  %s249_s11 = int_to_ptr.vmem [resolvable:$true] %s248_s11 }
  0x32   :  { %357 = vmatpush3.bf16.xpose.msra.mxu0 %v354_v5  ;;  %391 = vmatpush3.bf16.xpose.msra.mxu1 %v354_v5  ;;  %s447_s12 = scalar_lea.vmem %s249_s11, 2048  ;;  %p452_p3 = scmp.lt.s32.totalorder %s249_s11, %s249_s11 }
  0x33   :  { %359 = vmatprep.subr.bf16.mxu0 %v358_v10  ;;  %384 = vmatprep.subr.bf16.mxu1 %v358_v10  ;;  %p448_p2 = scmp.ne.s32.totalorder %s249_s11, %s447_s12  ;;  %p453_p4 = scmp.lt.s32.totalorder %s447_s12, %s447_s12 }
  0x35   :  { %p454_p5 = por %p453_p4, %p452_p3 }
  0x37   :  { %p455_p6 = pnand %p454_p5, %p448_p2 }
  0x3a   :  { %361 = vmatpush3.bf16.xpose.msra.mxu0 %v358_v10  ;;  %392 = vmatpush3.bf16.xpose.msra.mxu1 %v358_v10 }
  0x3b   :  { %363 = vmatprep.subr.bf16.mxu0 %v362_v13  ;;  %385 = vmatprep.subr.bf16.mxu1 %v362_v13 }
  0x42   :  { %365 = vmatpush3.bf16.xpose.msra.mxu0 %v362_v13  ;;  %393 = vmatpush3.bf16.xpose.msra.mxu1 %v362_v13 }
  0x43   :  { %367 = vmatprep.subr.bf16.mxu0 %v366_v16  ;;  %386 = vmatprep.subr.bf16.mxu1 %v366_v16 }
  0x4a   :  { %369 = vmatpush3.bf16.xpose.msra.mxu0 %v366_v16  ;;  %394 = vmatpush3.bf16.xpose.msra.mxu1 %v366_v16 }
  0x4b   :  { %371 = vmatprep.subr.bf16.mxu0 %v370_v19  ;;  %387 = vmatprep.subr.bf16.mxu1 %v370_v19 }
  0x52   :  { %373 = vmatpush3.bf16.xpose.msra.mxu0 %v370_v19  ;;  %395 = vmatpush3.bf16.xpose.msra.mxu1 %v370_v19 }
  0x53   :  { %375 = vmatprep.subr.bf16.mxu0 %v374_v22  ;;  %388 = vmatprep.subr.bf16.mxu1 %v374_v22 }
  0x5a   :  { %377 = vmatpush3.bf16.xpose.msra.mxu0 %v374_v22  ;;  %396 = vmatpush3.bf16.xpose.msra.mxu1 %v374_v22 }
  0x5b   :  { %379 = vmatprep.subr.bf16.mxu0 %v378_v25  ;;  %389 = vmatprep.subr.bf16.mxu1 %v378_v25 }
  0x62   :  { %381 = vmatpush3.bf16.xpose.msra.mxu0 %v378_v25  ;;  %397 = vmatpush3.bf16.xpose.msra.mxu1 %v378_v25 }
  0x69   :  { %327 = vmatmul.mubr.f32.vlgmr.msra.gmra.mrb[0].mxu0 %v44_v26  ;;  %339 = vmatmul.mubr.f32.vlgmr.msra.gmra.mrb[0].mxu1 %v52_v27 }
  0x6a   :  { %329 = vmatprep.mubr.f32.mxu0 %v45_v28  ;;  %341 = vmatprep.mubr.f32.mxu1 %v53_v29 }
  0x6d   :  { %330 = vmatmul.mubr.f32.gmra.mrb[2].mxu0 %v46_v30  ;;  %342 = vmatmul.mubr.f32.gmra.mrb[2].mxu1 %v54_v31 }
  0x6e   :  { %332 = vmatprep.mubr.f32.mxu0 %v47_v32  ;;  %344 = vmatprep.mubr.f32.mxu1 %v55_v33 }
  0x71   :  { %333 = vmatmul.mubr.f32.gmra.mrb[4].mxu0 %v48_v34  ;;  %345 = vmatmul.mubr.f32.gmra.mrb[4].mxu1 %v56_v35 }
  0x72   :  { %335 = vmatprep.mubr.f32.mxu0 %v49_v36  ;;  %347 = vmatprep.mubr.f32.mxu1 %v57_v37 }
  0x75   :  { %336 = vmatmul.mubr.f32.gmra.mrb[6].mxu0 %v50_v38  ;;  %348 = vmatmul.mubr.f32.gmra.mrb[6].mxu1 %v58_v39 }
 0x13c   :  { %v328_v41 = vpop.f32.mrb[0].mxu0  ;;  %v340_v42 = vpop.f32.mrb[0].mxu1 }
 0x13d   :  { %v154_v43 = vadd.f32 %v328_v41, %v261_v40  ;;  %v194_v44 = vadd.f32 %v340_v42, %v261_v40  ;;  %v148_v45 = vpop.f32.mrb[1].mxu0  ;;  %v188_v46 = vpop.f32.mrb[1].mxu1 }
 0x13e   :  { %v149_v47 = vadd.f32 %v261_v40, %v148_v45  ;;  %v189_v48 = vadd.f32 %v261_v40, %v188_v46 }
 0x13f   :  { %228 = vst [vmem:[#allocation7 + $0x8] sm:$0xff] %v154_v43  ;;  %236 = vst [vmem:[#allocation7 + $0x48] sm:$0xff] %v194_v44 }
 0x140   :  { %227 = vst [vmem:[#allocation7] sm:$0xff] %v149_v47  ;;  %235 = vst [vmem:[#allocation7 + $0x40] sm:$0xff] %v189_v48  ;;  %v331_v49 = vpop.f32.mrb[2].mxu0  ;;  %v343_v50 = vpop.f32.mrb[2].mxu1 }
 0x141   :  { %v164_v51 = vadd.f32 %v331_v49, %v261_v40  ;;  %v204_v52 = vadd.f32 %v343_v50, %v261_v40  ;;  %v158_v53 = vpop.f32.mrb[3].mxu0  ;;  %v198_v54 = vpop.f32.mrb[3].mxu1 }
 0x142   :  { %v159_v55 = vadd.f32 %v261_v40, %v158_v53  ;;  %v199_v56 = vadd.f32 %v261_v40, %v198_v54 }
 0x143   :  { %230 = vst [vmem:[#allocation7 + $0x18] sm:$0xff] %v164_v51  ;;  %238 = vst [vmem:[#allocation7 + $0x58] sm:$0xff] %v204_v52 }
 0x144   :  { %229 = vst [vmem:[#allocation7 + $0x10] sm:$0xff] %v159_v55  ;;  %237 = vst [vmem:[#allocation7 + $0x50] sm:$0xff] %v199_v56  ;;  %v334_v57 = vpop.f32.mrb[4].mxu0  ;;  %v346_v58 = vpop.f32.mrb[4].mxu1 }
 0x145   :  { %v174_v59 = vadd.f32 %v334_v57, %v261_v40  ;;  %v214_v60 = vadd.f32 %v346_v58, %v261_v40  ;;  %v168_v61 = vpop.f32.mrb[5].mxu0  ;;  %v208_v62 = vpop.f32.mrb[5].mxu1 }
 0x146   :  { %v169_v63 = vadd.f32 %v261_v40, %v168_v61  ;;  %v209_v0 = vadd.f32 %v261_v40, %v208_v62 }
 0x147   :  { %232 = vst [vmem:[#allocation7 + $0x28] sm:$0xff] %v174_v59  ;;  %240 = vst [vmem:[#allocation7 + $0x68] sm:$0xff] %v214_v60 }
 0x148   :  { %231 = vst [vmem:[#allocation7 + $0x20] sm:$0xff] %v169_v63  ;;  %239 = vst [vmem:[#allocation7 + $0x60] sm:$0xff] %v209_v0  ;;  %v337_v1 = vpop.f32.mrb[6].mxu0  ;;  %v349_v2 = vpop.f32.mrb[6].mxu1 }
 0x149   :  { %v184_v3 = vadd.f32 %v337_v1, %v261_v40  ;;  %v224_v4 = vadd.f32 %v349_v2, %v261_v40  ;;  %v178_v5 = vpop.f32.mrb[7].mxu0  ;;  %v218_v6 = vpop.f32.mrb[7].mxu1 }
 0x14a   :  { %v179_v7 = vadd.f32 %v261_v40, %v178_v5  ;;  %v219_v8 = vadd.f32 %v261_v40, %v218_v6 }
 0x14b   :  { %234 = vst [vmem:[#allocation7 + $0x38] sm:$0xff] %v184_v3  ;;  %242 = vst [vmem:[#allocation7 + $0x78] sm:$0xff] %v224_v4 }
 0x14c   :  { %233 = vst [vmem:[#allocation7 + $0x30] sm:$0xff] %v179_v7  ;;  %241 = vst [vmem:[#allocation7 + $0x70] sm:$0xff] %v219_v8 }
 0x14d   :  { %458 = shalt.err (!%p455_p6)
}
 0x14e   :  { %s459_s15 = scalar_lea.hbm %s551_s3, 2048 }
 0x14f   :  { %p460_p7 = scmp.ne.s32.totalorder %s551_s3, %s459_s15  ;;  %p463_p8 = scmp.lt.u32.totalorder %s459_s15, %s551_s3 }
 0x151   :  { %p465_p9 = pnand %p463_p8, %p460_p7 }
 0x153   :  { %468 = shalt.err (!%p465_p9)
}
 0x154   :  { %254 = dma.vmem_to_hbm [thread:$0]  %s249_s11, 2048, %s551_s3, [#allocation4], %s476_s22, %s476_s22, %s477_s23  }
 0x155   :  { %473 = dma.done.wait [#allocation4], 2048  }
 0x156   :  { %474 = vsyncadd [#allocation4], 4294965248 }
 0x157   :  { %258 = vsyncpa [#allocation3], 1 }
 0x158   :  { %259 = vsyncpa [#allocation6], 1 }
 0x159   :  { %260 = vsyncpa [#allocation4], 1 }

</bundles_post_ra>
